<compile_context>
chip_gen: v7x
topology: tpu7x:2x2x1
jax: 0.10.0
libtpu: 0.0.40
codegen_flags: <defaults>
</compile_context>

<pallas_src>
import functools

import jax
import jax.numpy as jnp
from jax.experimental import pallas as pl
from jax.experimental.pallas import tpu as pltpu

KSIZE = 3  # kernel_size=3 -> padding=1


# --------------------------------------------------------------------------- #
# Kernel bodies
# --------------------------------------------------------------------------- #
def _gate_from_block(x, w_ref, H, W):
    """sigmoid(conv2d_3x3([mean_c, max_c](x), w, pad=1, no bias)).

    x     : (B, C, S) f32, S = H*W flattened spatial (lane-dense)
    w_ref : (2*K*K,)  SMEM flattened OIHW weight; avg taps pre-scaled by 1/C
    returns (B, S) f32
    """
    B, C, S = x.shape
    K = KSIZE

    s = jnp.sum(x, axis=1)                  # channel sum (1/C folded into w)
    m = jnp.max(x, axis=1)                  # channel max
    # Stack on the sublane axis: one roll moves both planes at once.
    z = jnp.concatenate([s, m], axis=0)     # (2B, S)

    # Row / column of every flattened pixel, built once at (1, S) and
    # broadcast over sublanes.  Power-of-two W uses bit ops only.
    idx = jax.lax.broadcasted_iota(jnp.int32, (1, S), 1)
    if W & (W - 1) == 0:
        col = jnp.bitwise_and(idx, W - 1)
        row = jnp.right_shift(idx, W.bit_length() - 1)
    else:  # TODO(synk): general-W fallback is correct but slow (vector div/mod)
        col = idx % W
        row = idx // W

    # Horizontal taps.  Column masks (the conv's zero padding at the left /
    # right image edges) are pre-applied ONCE here; they are invariant to the
    # later row shifts because those move whole rows (multiples of W).
    # pltpu.roll runs on the XLU slot and co-issues under the VPU MACs.
    z_l = jnp.where(col >= 1, pltpu.roll(z, 1, axis=1), 0.0)          # in[p-1]
    z_r = jnp.where(col <= W - 2, pltpu.roll(z, S - 1, axis=1), 0.0)  # in[p+1]

    # Per-sublane tap weights: top half (channel sum) gets the avg-channel
    # weights (already scaled by 1/C on the host), bottom half (channel max)
    # gets the max-channel weights, so one MAC over (2B, S) covers both.
    half = jax.lax.broadcasted_iota(jnp.int32, (2 * B, 1), 0) < B

    def wv(dy, dx):
        w_avg = w_ref[(dy + 1) * K + (dx + 1)]           # channel 0 = avg
        w_max = w_ref[K * K + (dy + 1) * K + (dx + 1)]   # channel 1 = max
        return jnp.where(half, w_avg, w_max)             # (2B, 1)

    def hrow(dy):  # horizontal 3-tap MAC for conv row dy
        return wv(dy, -1) * z_l + wv(dy, 0) * z + wv(dy, 1) * z_r

    # Vertical taps: roll the pre-combined rows by +-W and zero the rows the
    # conv's zero padding would have produced.  4 rolls total for the 3x3 conv.
    acc = hrow(0)
    acc = acc + jnp.where(row >= 1, pltpu.roll(hrow(-1), W, axis=1), 0.0)
    acc = acc + jnp.where(row <= H - 2, pltpu.roll(hrow(1), S - W, axis=1), 0.0)

    # Fold the two sublane halves (avg + max contributions) and squash.
    return jax.nn.sigmoid(acc[:B, :] + acc[B:, :])       # (B, S)


def spatial_attention_kernel(x_ref, w_ref, gate_ref, *, H, W):
    """gate_ref: (bn, S) lane-dense attention map (no singleton channel dim)."""
    x = x_ref[...].astype(jnp.float32)
    gate_ref[...] = _gate_from_block(x, w_ref, H, W).astype(gate_ref.dtype)


def spatial_attention_fused_kernel(x_ref, w_ref, gate_ref, xg_ref, *, H, W):
    """Also emits x * gate while x is still resident in VMEM (the product every
    TeLM call site computes right after sa1), saving one HBM round trip of x."""
    x = x_ref[...].astype(jnp.float32)
    gate = _gate_from_block(x, w_ref, H, W)
    gate_ref[...] = gate.astype(gate_ref.dtype)
    xg_ref[...] = (x * gate[:, None, :]).astype(xg_ref.dtype)


# --------------------------------------------------------------------------- #
# Wrapper / tiling
# --------------------------------------------------------------------------- #
def _vmem_capacity_bytes():
    try:
        return int(pltpu.get_tpu_info().vmem_capacity_bytes)
    except Exception:
        return 64 << 20  # conservative fallback (v7x per-TensorCore VMEM)


def _pick_bn(N, C, S, itemsize, vmem_budget):
    """Images per grid step.

    Fill the sublane axis (8 for f32, 16 for bf16), then grow toward ~1 MiB of
    input per block (HBM-roofline territory, amortizes the ~0.35us/step grid
    overhead) while (a) the double-buffered block set + f32 intermediates fit
    the per-generation VMEM budget, (b) the unrolled tap loop's live set stays
    modest (bn <= 64), and (c) at least two grid steps remain so both v7x
    TensorCores get work.
    """
    def vmem_bytes(b):
        io = 2 * 2 * b * (C + 1) * S * itemsize   # double-buffered in + gate out
        tmp = 8 * 2 * b * S * 4                   # stacked f32 temporaries
        return io + tmp

    bn = 16 if itemsize <= 2 else 8
    while bn > 1 and vmem_bytes(bn) > vmem_budget:
        bn //= 2
    while (bn < 64
           and bn * C * S * itemsize < (1 << 20)
           and vmem_bytes(2 * bn) <= vmem_budget
           and N // (2 * bn) >= 2):
        bn *= 2
    return max(bn, 1)


def _spatial_attention_call(x, w, *, fuse_multiply):
    N, C, H, W = x.shape
    S = H * W

    # Lane-dense layout: flatten the spatial dims onto the 128-lane axis.
    # (For bandwidth-bound production sizes, pass x as bf16; the kernel
    # accumulates in f32 either way.)
    x_flat = x.reshape(N, C, S)

    # Fold the channel-mean 1/C into the avg-channel taps; flatten for SMEM.
    chan_scale = jnp.array([1.0 / C, 1.0], jnp.float32).reshape(1, 2, 1, 1)
    w_flat = (w.astype(jnp.float32) * chan_scale).reshape(-1)     # (2*K*K,)

    vmem_cap = _vmem_capacity_bytes()
    bn = _pick_bn(N, C, S, x.dtype.itemsize, vmem_cap // 3)

    # Zero-pad the batch so every block is full (keeps sublane slices aligned);
    # padded rows are sliced off below.
    n_pad = (-N) % bn
    if n_pad:
        x_flat = jnp.pad(x_flat, ((0, n_pad), (0, 0), (0, 0)))
    n_total = N + n_pad
    grid = (n_total // bn,)

    in_specs = [
        pl.BlockSpec((bn, C, S), lambda n: (n, 0, 0)),
        pl.BlockSpec(memory_space=pltpu.SMEM),    # tiny conv weight as scalars
    ]
    gate_spec = pl.BlockSpec((bn, S), lambda n: (n, 0))   # lane-dense output

    if fuse_multiply:
        kernel = functools.partial(spatial_attention_fused_kernel, H=H, W=W)
        out_shape = (jax.ShapeDtypeStruct((n_total, S), x.dtype),
                     jax.ShapeDtypeStruct((n_total, C, S), x.dtype))
        out_specs = [gate_spec, pl.BlockSpec((bn, C, S), lambda n: (n, 0, 0))]
    else:
        kernel = functools.partial(spatial_attention_kernel, H=H, W=W)
        out_shape = jax.ShapeDtypeStruct((n_total, S), x.dtype)
        out_specs = gate_spec

    out = pl.pallas_call(
        kernel,
        out_shape=out_shape,
        grid_spec=pltpu.PrefetchScalarGridSpec(
            num_scalar_prefetch=0,
            grid=grid,
            in_specs=in_specs,
            out_specs=out_specs,
        ),
        compiler_params=pltpu.CompilerParams(
            dimension_semantics=("parallel",),
            vmem_limit_bytes=min(vmem_cap // 2, 96 << 20),
        ),
    )(x_flat, w_flat)

    if fuse_multiply:
        gate, xg = out
        return (gate[:N].reshape(N, 1, H, W), xg[:N].reshape(N, C, H, W))
    return out[:N].reshape(N, 1, H, W)


def spatial_attention(x, w):
    """SpatialAttention.forward: x (N,C,H,W), w (1,2,K,K) OIHW -> (N,1,H,W)."""
    return _spatial_attention_call(x, w, fuse_multiply=False)


def spatial_attention_fused(x, w):
    """Returns (gate, x * gate); the fused product is what TeLM consumes next."""
    return _spatial_attention_call(x, w, fuse_multiply=True)


# --------------------------------------------------------------------------- #
# Reference + demo
# --------------------------------------------------------------------------- #
def reference(x, w):
    """Plain-JAX reference matching the PyTorch forward."""
    avg = jnp.mean(x, axis=1, keepdims=True)
    mx = jnp.max(x, axis=1, keepdims=True)
    cat = jnp.concatenate([avg, mx], axis=1)  # (N, 2, H, W)
    out = jax.lax.conv_general_dilated(
        cat, w, window_strides=(1, 1), padding="SAME",
        dimension_numbers=("NCHW", "OIHW", "NCHW"))
    return jax.nn.sigmoid(out)


if __name__ == "__main__":
    key = jax.random.PRNGKey(0)
    kx, kw = jax.random.split(key)

    N, C, H, W = 2, 4, 16, 16
    x = jax.random.normal(kx, (N, C, H, W), dtype=jnp.float32)

    # Deterministic conv weight init (Kaiming-uniform-like bound, as in
    # torch.nn.Conv2d default): shape (out=1, in=2, K, K), no bias.
    fan_in = 2 * KSIZE * KSIZE
    bound = 1.0 / jnp.sqrt(jnp.float32(fan_in))
    w = jax.random.uniform(kw, (1, 2, KSIZE, KSIZE), dtype=jnp.float32,
                           minval=-bound, maxval=bound)

    gate = jax.block_until_ready(spatial_attention(x, w))
    gate_f, xg_f = spatial_attention_fused(x, w)
    jax.block_until_ready((gate_f, xg_f))

    ref_gate = reference(x, w)
    assert gate.shape == (N, 1, H, W)
    assert jnp.allclose(gate, ref_gate, atol=1e-5, rtol=1e-5), "gate mismatch"
    assert jnp.allclose(gate_f, ref_gate, atol=1e-5, rtol=1e-5), "fused gate mismatch"
    assert jnp.allclose(xg_f, x * ref_gate, atol=1e-5, rtol=1e-5), "fused x*gate mismatch"

    print("KERNEL_OK")
</pallas_src>

<mosaic_0001>
module attributes {stable_mosaic.version = 11 : i64} {
  func.func @spatial_attention_kernel(%arg0: i32, %arg1: memref<8x4x256xf32, #tpu.memory_space<vmem>>, %arg2: memref<18xf32, #tpu.memory_space<smem>>, %arg3: memref<8x256xf32, #tpu.memory_space<vmem>>) attributes {dimension_semantics = [#tpu.dimension_semantics<parallel>], iteration_bounds = array<i64: 1>, scalar_prefetch = 0 : i64, scratch_operands = 0 : i64, tpu.core_type = #tpu.core_type<tc>, window_params = [{transform_indices = @transform_0, window_bounds = array<i64: 8, 4, 256>}, {transform_indices = @transform_1, window_bounds = array<i64: 18>}, {transform_indices = @transform_2, window_bounds = array<i64: 8, 256>}]} {
    %c0 = arith.constant 0 : index
    %c0_0 = arith.constant 0 : index
    %c0_1 = arith.constant 0 : index
    %0 = vector.load %arg1[%c0, %c0_0, %c0_1] : memref<8x4x256xf32, #tpu.memory_space<vmem>>, vector<8x4x256xf32>
    %cst = arith.constant dense<0.000000e+00> : vector<8x256xf32>
    %1 = vector.multi_reduction <add>, %0, %cst [1] : vector<8x4x256xf32> to vector<8x256xf32>
    %cst_2 = arith.constant dense<0xFF800000> : vector<8x256xf32>
    %2 = vector.multi_reduction <maximumf>, %0, %cst_2 [1] : vector<8x4x256xf32> to vector<8x256xf32>
    %3 = tpu.concatenate %1, %2 in 0 : vector<8x256xf32>, vector<8x256xf32> -> vector<16x256xf32>
    %4 = tpu.iota {dimensions = array<i32: 1>} : vector<1x256xi32>
    %c15_i32 = arith.constant 15 : i32
    %5 = vector.broadcast %c15_i32 : i32 to vector<1x256xi32>
    %6 = arith.andi %4, %5 : vector<1x256xi32>
    %c4_i32 = arith.constant 4 : i32
    %7 = vector.broadcast %c4_i32 : i32 to vector<1x256xi32>
    %8 = arith.shrsi %4, %7 : vector<1x256xi32>
    %c1_i32 = arith.constant 1 : i32
    %9 = vector.broadcast %c1_i32 : i32 to vector<1x256xi32>
    %10 = arith.cmpi sge, %6, %9 : vector<1x256xi32>
    %c1_i32_3 = arith.constant 1 : i32
    %11 = tpu.dynamic_rotate %3 by %c1_i32_3 dim 1 : vector<16x256xf32>, i32 -> vector<16x256xf32>
    %cst_4 = arith.constant 0.000000e+00 : f32
    %12 = vector.shape_cast %10 : vector<1x256xi1> to vector<1x256xi1>
    %13 = vector.broadcast %12 : vector<1x256xi1> to vector<16x256xi1>
    %14 = vector.broadcast %cst_4 : f32 to vector<16x256xf32>
    %15 = arith.select %13, %11, %14 : vector<16x256xi1>, vector<16x256xf32>
    %c14_i32 = arith.constant 14 : i32
    %16 = vector.broadcast %c14_i32 : i32 to vector<1x256xi32>
    %17 = arith.cmpi sle, %6, %16 : vector<1x256xi32>
    %c255_i32 = arith.constant 255 : i32
    %18 = tpu.dynamic_rotate %3 by %c255_i32 dim 1 : vector<16x256xf32>, i32 -> vector<16x256xf32>
    %cst_5 = arith.constant 0.000000e+00 : f32
    %19 = vector.shape_cast %17 : vector<1x256xi1> to vector<1x256xi1>
    %20 = vector.broadcast %19 : vector<1x256xi1> to vector<16x256xi1>
    %21 = vector.broadcast %cst_5 : f32 to vector<16x256xf32>
    %22 = arith.select %20, %18, %21 : vector<16x256xi1>, vector<16x256xf32>
    %23 = tpu.iota {dimensions = array<i32: 0>} : vector<16x1xi32>
    %c8_i32 = arith.constant 8 : i32
    %24 = vector.broadcast %c8_i32 : i32 to vector<16x1xi32>
    %25 = arith.cmpi slt, %23, %24 : vector<16x1xi32>
    %c3 = arith.constant 3 : index
    %26 = memref.load %arg2[%c3] : memref<18xf32, #tpu.memory_space<smem>>
    %c12 = arith.constant 12 : index
    %27 = memref.load %arg2[%c12] : memref<18xf32, #tpu.memory_space<smem>>
    %28 = vector.broadcast %26 : f32 to vector<16x1xf32>
    %29 = vector.broadcast %27 : f32 to vector<16x1xf32>
    %30 = arith.select %25, %28, %29 : vector<16x1xi1>, vector<16x1xf32>
    %31 = vector.broadcast %30 : vector<16x1xf32> to vector<16x256xf32>
    %32 = arith.mulf %31, %15 : vector<16x256xf32>
    %c4 = arith.constant 4 : index
    %33 = memref.load %arg2[%c4] : memref<18xf32, #tpu.memory_space<smem>>
    %c13 = arith.constant 13 : index
    %34 = memref.load %arg2[%c13] : memref<18xf32, #tpu.memory_space<smem>>
    %35 = vector.broadcast %33 : f32 to vector<16x1xf32>
    %36 = vector.broadcast %34 : f32 to vector<16x1xf32>
    %37 = arith.select %25, %35, %36 : vector<16x1xi1>, vector<16x1xf32>
    %38 = vector.broadcast %37 : vector<16x1xf32> to vector<16x256xf32>
    %39 = arith.mulf %38, %3 : vector<16x256xf32>
    %40 = arith.addf %32, %39 : vector<16x256xf32>
    %c5 = arith.constant 5 : index
    %41 = memref.load %arg2[%c5] : memref<18xf32, #tpu.memory_space<smem>>
    %c14 = arith.constant 14 : index
    %42 = memref.load %arg2[%c14] : memref<18xf32, #tpu.memory_space<smem>>
    %43 = vector.broadcast %41 : f32 to vector<16x1xf32>
    %44 = vector.broadcast %42 : f32 to vector<16x1xf32>
    %45 = arith.select %25, %43, %44 : vector<16x1xi1>, vector<16x1xf32>
    %46 = vector.broadcast %45 : vector<16x1xf32> to vector<16x256xf32>
    %47 = arith.mulf %46, %22 : vector<16x256xf32>
    %48 = arith.addf %40, %47 : vector<16x256xf32>
    %c1_i32_6 = arith.constant 1 : i32
    %49 = vector.broadcast %c1_i32_6 : i32 to vector<1x256xi32>
    %50 = arith.cmpi sge, %8, %49 : vector<1x256xi32>
    %c0_7 = arith.constant 0 : index
    %51 = memref.load %arg2[%c0_7] : memref<18xf32, #tpu.memory_space<smem>>
    %c9 = arith.constant 9 : index
    %52 = memref.load %arg2[%c9] : memref<18xf32, #tpu.memory_space<smem>>
    %53 = vector.broadcast %51 : f32 to vector<16x1xf32>
    %54 = vector.broadcast %52 : f32 to vector<16x1xf32>
    %55 = arith.select %25, %53, %54 : vector<16x1xi1>, vector<16x1xf32>
    %56 = vector.broadcast %55 : vector<16x1xf32> to vector<16x256xf32>
    %57 = arith.mulf %56, %15 : vector<16x256xf32>
    %c1 = arith.constant 1 : index
    %58 = memref.load %arg2[%c1] : memref<18xf32, #tpu.memory_space<smem>>
    %c10 = arith.constant 10 : index
    %59 = memref.load %arg2[%c10] : memref<18xf32, #tpu.memory_space<smem>>
    %60 = vector.broadcast %58 : f32 to vector<16x1xf32>
    %61 = vector.broadcast %59 : f32 to vector<16x1xf32>
    %62 = arith.select %25, %60, %61 : vector<16x1xi1>, vector<16x1xf32>
    %63 = vector.broadcast %62 : vector<16x1xf32> to vector<16x256xf32>
    %64 = arith.mulf %63, %3 : vector<16x256xf32>
    %65 = arith.addf %57, %64 : vector<16x256xf32>
    %c2 = arith.constant 2 : index
    %66 = memref.load %arg2[%c2] : memref<18xf32, #tpu.memory_space<smem>>
    %c11 = arith.constant 11 : index
    %67 = memref.load %arg2[%c11] : memref<18xf32, #tpu.memory_space<smem>>
    %68 = vector.broadcast %66 : f32 to vector<16x1xf32>
    %69 = vector.broadcast %67 : f32 to vector<16x1xf32>
    %70 = arith.select %25, %68, %69 : vector<16x1xi1>, vector<16x1xf32>
    %71 = vector.broadcast %70 : vector<16x1xf32> to vector<16x256xf32>
    %72 = arith.mulf %71, %22 : vector<16x256xf32>
    %73 = arith.addf %65, %72 : vector<16x256xf32>
    %c16_i32 = arith.constant 16 : i32
    %74 = tpu.dynamic_rotate %73 by %c16_i32 dim 1 : vector<16x256xf32>, i32 -> vector<16x256xf32>
    %cst_8 = arith.constant 0.000000e+00 : f32
    %75 = vector.shape_cast %50 : vector<1x256xi1> to vector<1x256xi1>
    %76 = vector.broadcast %75 : vector<1x256xi1> to vector<16x256xi1>
    %77 = vector.broadcast %cst_8 : f32 to vector<16x256xf32>
    %78 = arith.select %76, %74, %77 : vector<16x256xi1>, vector<16x256xf32>
    %79 = arith.addf %48, %78 : vector<16x256xf32>
    %c14_i32_9 = arith.constant 14 : i32
    %80 = vector.broadcast %c14_i32_9 : i32 to vector<1x256xi32>
    %81 = arith.cmpi sle, %8, %80 : vector<1x256xi32>
    %c6 = arith.constant 6 : index
    %82 = memref.load %arg2[%c6] : memref<18xf32, #tpu.memory_space<smem>>
    %c15 = arith.constant 15 : index
    %83 = memref.load %arg2[%c15] : memref<18xf32, #tpu.memory_space<smem>>
    %84 = vector.broadcast %82 : f32 to vector<16x1xf32>
    %85 = vector.broadcast %83 : f32 to vector<16x1xf32>
    %86 = arith.select %25, %84, %85 : vector<16x1xi1>, vector<16x1xf32>
    %87 = vector.broadcast %86 : vector<16x1xf32> to vector<16x256xf32>
    %88 = arith.mulf %87, %15 : vector<16x256xf32>
    %c7 = arith.constant 7 : index
    %89 = memref.load %arg2[%c7] : memref<18xf32, #tpu.memory_space<smem>>
    %c16 = arith.constant 16 : index
    %90 = memref.load %arg2[%c16] : memref<18xf32, #tpu.memory_space<smem>>
    %91 = vector.broadcast %89 : f32 to vector<16x1xf32>
    %92 = vector.broadcast %90 : f32 to vector<16x1xf32>
    %93 = arith.select %25, %91, %92 : vector<16x1xi1>, vector<16x1xf32>
    %94 = vector.broadcast %93 : vector<16x1xf32> to vector<16x256xf32>
    %95 = arith.mulf %94, %3 : vector<16x256xf32>
    %96 = arith.addf %88, %95 : vector<16x256xf32>
    %c8 = arith.constant 8 : index
    %97 = memref.load %arg2[%c8] : memref<18xf32, #tpu.memory_space<smem>>
    %c17 = arith.constant 17 : index
    %98 = memref.load %arg2[%c17] : memref<18xf32, #tpu.memory_space<smem>>
    %99 = vector.broadcast %97 : f32 to vector<16x1xf32>
    %100 = vector.broadcast %98 : f32 to vector<16x1xf32>
    %101 = arith.select %25, %99, %100 : vector<16x1xi1>, vector<16x1xf32>
    %102 = vector.broadcast %101 : vector<16x1xf32> to vector<16x256xf32>
    %103 = arith.mulf %102, %22 : vector<16x256xf32>
    %104 = arith.addf %96, %103 : vector<16x256xf32>
    %c240_i32 = arith.constant 240 : i32
    %105 = tpu.dynamic_rotate %104 by %c240_i32 dim 1 : vector<16x256xf32>, i32 -> vector<16x256xf32>
    %cst_10 = arith.constant 0.000000e+00 : f32
    %106 = vector.shape_cast %81 : vector<1x256xi1> to vector<1x256xi1>
    %107 = vector.broadcast %106 : vector<1x256xi1> to vector<16x256xi1>
    %108 = vector.broadcast %cst_10 : f32 to vector<16x256xf32>
    %109 = arith.select %107, %105, %108 : vector<16x256xi1>, vector<16x256xf32>
    %110 = arith.addf %79, %109 : vector<16x256xf32>
    %111 = vector.extract_strided_slice %110 {offsets = [0, 0], sizes = [8, 256], strides = [1, 1]} : vector<16x256xf32> to vector<8x256xf32>
    %112 = vector.extract_strided_slice %110 {offsets = [8, 0], sizes = [8, 256], strides = [1, 1]} : vector<16x256xf32> to vector<8x256xf32>
    %113 = arith.addf %111, %112 : vector<8x256xf32>
    %114 = arith.negf %113 : vector<8x256xf32>
    %115 = math.exp %114 : vector<8x256xf32>
    %cst_11 = arith.constant 1.000000e+00 : f32
    %116 = vector.broadcast %cst_11 : f32 to vector<8x256xf32>
    %117 = arith.addf %116, %115 : vector<8x256xf32>
    %118 = arith.divf %116, %117 : vector<8x256xf32>
    %c0_12 = arith.constant 0 : index
    %c0_13 = arith.constant 0 : index
    %119 = vector.load %arg3[%c0_12, %c0_13] : memref<8x256xf32, #tpu.memory_space<vmem>>, vector<8x256xf32>
    tpu.vector_store %arg3[%c0_12, %c0_13], %118 {strides = array<i32>} : memref<8x256xf32, #tpu.memory_space<vmem>>, vector<8x256xf32>,
    return
  }
  func.func @transform_0(%arg0: i32) -> (i32, i32, i32) {
    %c0_i32 = arith.constant 0 : i32
    %c0_i32_0 = arith.constant 0 : i32
    %c0_i32_1 = arith.constant 0 : i32
    return %arg0, %c0_i32, %c0_i32_0 : i32, i32, i32
  }
  func.func @transform_1(%arg0: i32) -> i32 {
    %c0_i32 = arith.constant 0 : i32
    %c0_i32_0 = arith.constant 0 : i32
    return %c0_i32 : i32
  }
  func.func @transform_2(%arg0: i32) -> (i32, i32) {
    %c0_i32 = arith.constant 0 : i32
    %c0_i32_0 = arith.constant 0 : i32
    return %arg0, %c0_i32 : i32, i32
  }
}

</mosaic_0001>

<bundles_post_ra>
// kernel: tpu_custom_call.1
= control target key start
LH: loop header
LB: loop body
LE: loop exit
PB: predicated region body
PF: predicated region fallthrough
CT: control target
= control target key end

     0   :  { %7 = vsyncpa [#allocation3], 0  ;;  %s1132_s0 = inlined_call_operand.hbm [shape: f32[8,4,256], index: 0, kind: input, shape index: {}]   ;;  %s1133_s1 = inlined_call_operand.vmem [shape: f32[18], index: 1, kind: input, shape index: {}]   ;;  %s1134_s2 = inlined_call_operand.hbm [shape: f32[8,256], index: 2, kind: output, shape index: {}]  }
   0x1   :  { %8 = vsyncpa [#allocation5], 0 }
   0x2   :  { %9 = vsyncpa [#allocation4], 0  ;;  %s731_s9 = smov [#allocation2]   ;;  %s28_s13 = sshll.u32 %s1133_s1, 4  ;;  %s29_s13 = int_to_ptr.vmem [resolvable:$true] %s28_s13 }
   0x3   :  { %s15_s10 = sshll.u32 %s731_s9, 4  ;;  %s669_s16 = scalar_lea.hbm %s1132_s0, 1024  ;;  %s16_s10 = int_to_ptr.vmem [resolvable:$true] %s15_s10 }
   0x4   :  { %p670_p0 = scmp.ne.s32.totalorder %s1132_s0, %s669_s16  ;;  %p673_p1 = scmp.lt.u32.totalorder %s669_s16, %s1132_s0 }
   0x6   :  { %p675_p2 = pnand %p673_p1, %p670_p0 }
   0x8   :  { %678 = shalt.err (!%p675_p2)
}
   0x9   :  { %s679_s21 = scalar_lea.vmem %s16_s10, 1024  ;;  %p684_p4 = scmp.lt.s32.totalorder %s16_s10, %s16_s10 }
   0xa   :  { %p680_p3 = scmp.ne.s32.totalorder %s16_s10, %s679_s21  ;;  %p685_p5 = scmp.lt.s32.totalorder %s679_s21, %s679_s21 }
   0xc   :  { %p686_p6 = por %p685_p5, %p684_p4 }
   0xe   :  { %p687_p7 = pnand %p686_p6, %p680_p3 }
  0x10   :  { %690 = shalt.err (!%p687_p7)
}
  0x11   :  { %s732_s1 = smov 128   ;;  %s733_s22 = smov 8  }
  0x12   :  { %21 = dma.hbm_to_vmem [thread:$0]  %s1132_s0, 1024, %s16_s10, [#allocation3], %s732_s1, %s732_s1, %s733_s22  }
  0x13   :  { %s691_s25 = scalar_lea.vmem %s29_s13, 16  ;;  %p696_p9 = scmp.lt.s32.totalorder %s29_s13, %s29_s13 }
  0x14   :  { %p692_p8 = scmp.ne.s32.totalorder %s29_s13, %s691_s25  ;;  %p697_p10 = scmp.lt.s32.totalorder %s691_s25, %s691_s25 }
  0x16   :  { %p698_p11 = por %p697_p10, %p696_p9 }
  0x18   :  { %p699_p12 = pnand %p698_p11, %p692_p8 }
  0x1a   :  { %702 = shalt.err (!%p699_p12)
}
  0x1b   :  { %s734_s26 = smov [#allocation6]  }
  0x1c   :  { %31 = dma.vmem_to_smem %s29_s13, 16, %s734_s26, [#allocation5]  }
  0x1d   :  { %725 = dma.done.wait [#allocation3], 1024  }
  0x1e   :  { %726 = vsyncadd [#allocation3], 4294966272 }
  0x1f   :  { %727 = dma.done.wait [#allocation5], 16  }
  0x20   :  { %728 = vsyncadd [#allocation5], 4294967280 }
  0x21   :  { %38 = sfence }
  0x22   :  { %v770_v0 = vld [vmem:[#allocation2] sm:$0xff]  ;;  %v772_v1 = vld [vmem:[#allocation2 + $0x8] sm:$0xff]  ;;  %v774_v2 = vld [vmem:[#allocation2 + $0x10] sm:$0xff]  ;;  %vm71_vm0 = vcmask 1043456   ;;  %vm312_vm1 = vcmask 1041409   ;;  %vm314_vm2 = vcmask 1042434  }
  0x23   :  { %v776_v3 = vld [vmem:[#allocation2 + $0x18] sm:$0xff]  ;;  %v778_v4 = vld [vmem:[#allocation2 + $0x20] sm:$0xff]  ;;  %v780_v5 = vld [vmem:[#allocation2 + $0x28] sm:$0xff]  ;;  %v184_v6 = vsel %vm71_vm0, %v770_v0, -inf  ;;  %v198_v7 = vsel %vm71_vm0, %v772_v1, -inf  ;;  %v212_v8 = vsel %vm71_vm0, %v774_v2, -inf  ;;  %v790_v9 = vcombine.high %v770_v0, %v770_v0 }
  0x24   :  { %v792_v10 = vld [vmem:[#allocation2 + $0x30] sm:$0xff]  ;;  %v794_v11 = vld [vmem:[#allocation2 + $0x38] sm:$0xff]  ;;  %v185_v12 = vrot.slane %v184_v6, 4  ;;  %v199_v13 = vrot.slane %v198_v7, 4  ;;  %v213_v14 = vrot.slane %v212_v8, 4  ;;  %v226_v15 = vsel %vm71_vm0, %v776_v3, -inf }
  0x25   :  { %v227_v16 = vrot.slane %v226_v15, 4  ;;  %v240_v17 = vsel %vm71_vm0, %v778_v4, -inf  ;;  %v254_v18 = vsel %vm71_vm0, %v780_v5, -inf  ;;  %v268_v19 = vsel %vm71_vm0, %v792_v10, -inf  ;;  %s735_s0 = smov 127   ;;  %s736_s27 = smov 1  }
  0x26   :  { %v186_v20 = vmax.f32 %v184_v6, %v185_v12  ;;  %v200_v21 = vmax.f32 %v198_v7, %v199_v13  ;;  %v214_v22 = vmax.f32 %v212_v8, %v213_v14  ;;  %v241_v23 = vrot.slane %v240_v17, 4  ;;  %s627_s28 = sld [smem:[#allocation6 + $0x4]]  ;;  %s938_s29 = sld [smem:[#allocation6 + $0x1]] }
  0x27   :  { %v228_v24 = vmax.f32 %v226_v15, %v227_v16  ;;  %v255_v25 = vrot.slane %v254_v18, 4  ;;  %v269_v26 = vrot.slane %v268_v19, 4  ;;  %v282_v27 = vsel %vm71_vm0, %v794_v11, -inf  ;;  %s943_s30 = sld [smem:[#allocation6 + $0x3]]  ;;  %s945_s3 = sld [smem:[#allocation6]] }
  0x28   :  { %v187_v28 = vrot.slane %v186_v20, 2  ;;  %v201_v29 = vrot.slane %v200_v21, 2  ;;  %v215_v30 = vrot.slane %v214_v22, 2  ;;  %v242_v31 = vmax.f32 %v240_v17, %v241_v23  ;;  %s947_s4 = sld [smem:[#allocation6 + $0x5]]  ;;  %s949_s5 = sld [smem:[#allocation6 + $0x2]] }
  0x29   :  { %v229_v32 = vrot.slane %v228_v24, 2  ;;  %v256_v33 = vmax.f32 %v254_v18, %v255_v25  ;;  %v270_v34 = vmax.f32 %v268_v19, %v269_v26  ;;  %v283_v35 = vrot.slane %v282_v27, 4  ;;  %s969_s6 = sld [smem:[#allocation6 + $0x6]]  ;;  %s979_s7 = sld [smem:[#allocation6 + $0x7]] }
  0x2a   :  { %v188_v36 = vmax.f32 %v186_v20, %v187_v28  ;;  %v202_v37 = vmax.f32 %v200_v21, %v201_v29  ;;  %v216_v38 = vmax.f32 %v214_v22, %v215_v30  ;;  %v243_v39 = vrot.slane %v242_v31, 2  ;;  %s989_s8 = sld [smem:[#allocation6 + $0x8]]  ;;  %s1003_s9 = sld [smem:[#allocation6 + $0xd]] }
  0x2b   :  { %v230_v40 = vmax.f32 %v228_v24, %v229_v32  ;;  %v257_v41 = vrot.slane %v256_v33, 2  ;;  %v271_v42 = vrot.slane %v270_v34, 2  ;;  %v284_v43 = vmax.f32 %v282_v27, %v283_v35  ;;  %s1007_s10 = sld [smem:[#allocation6 + $0xc]]  ;;  %s1014_s11 = sld [smem:[#allocation6 + $0x9]] }
  0x2c   :  { %v189_v44 = vrot.slane %v188_v36, 1  ;;  %v203_v45 = vrot.slane %v202_v37, 1  ;;  %v217_v46 = vrot.slane %v216_v38, 1  ;;  %v244_v47 = vmax.f32 %v242_v31, %v243_v39  ;;  %s1016_s12 = sld [smem:[#allocation6 + $0xa]]  ;;  %s737_s13 = smov 16  }
  0x2d   :  { %v231_v48 = vrot.slane %v230_v40, 1  ;;  %v258_v49 = vmax.f32 %v256_v33, %v257_v41  ;;  %v272_v50 = vmax.f32 %v270_v34, %v271_v42  ;;  %v285_v51 = vrot.slane %v284_v43, 2  ;;  %s1021_s14 = sld [smem:[#allocation6 + $0xe]]  ;;  %s1023_s15 = sld [smem:[#allocation6 + $0xb]] }
  0x2e   :  { %v190_v52 = vmax.f32 %v188_v36, %v189_v44  ;;  %v204_v53 = vmax.f32 %v202_v37, %v203_v45  ;;  %v218_v54 = vmax.f32 %v216_v38, %v217_v46  ;;  %v245_v55 = vrot.slane %v244_v47, 1  ;;  %s1030_s16 = sld [smem:[#allocation6 + $0xf]]  ;;  %s1033_s17 = sld [smem:[#allocation6 + $0x10]] }
  0x2f   :  { %v232_v56 = vmax.f32 %v230_v40, %v231_v48  ;;  %v259_v57 = vrot.slane %v258_v49, 1  ;;  %v273_v58 = vrot.slane %v272_v50, 1  ;;  %v286_v59 = vmax.f32 %v284_v43, %v285_v51  ;;  %s1047_s18 = sld [smem:[#allocation6 + $0x11]]  ;;  %s738_s19 = smov 112  }
  0x30   :  { %v246_v60 = vmax.f32 %v244_v47, %v245_v55  ;;  %vm316_vm3 = vcmask 1043459   ;;  %vm318_vm4 = vcmask 1044484   ;;  %vm320_vm5 = vcmask 1045509   ;;  %s739_s20 = smov [#allocation7]  }
  0x31   :  { %v260_v61 = vmax.f32 %v258_v49, %v259_v57  ;;  %v274_v62 = vmax.f32 %v272_v50, %v273_v58  ;;  %v287_v63 = vrot.slane %v286_v59, 1  ;;  %vm322_vm6 = vcmask 1046534   ;;  %s615_s21 = sshll.u32 %s739_s20, 4  ;;  %s616_s21 = int_to_ptr.vmem [resolvable:$true] %s615_s21 }
  0x32   :  { %vm324_vm7 = vcmask 1047559   ;;  %v351_v6 = vsel %vm312_vm1, %v204_v53, %v190_v52  ;;  %v72_v7 = vsel %vm71_vm0, %v770_v0, 0.0  ;;  %v86_v8 = vsel %vm71_vm0, %v772_v1, 0.0  ;;  %s703_s1 = scalar_lea.vmem %s616_s21, 256  ;;  %p708_p0 = scmp.lt.s32.totalorder %s616_s21, %s616_s21 }
  0x33   :  { %v288_v12 = vmax.f32 %v286_v59, %v287_v63  ;;  %v352_v13 = vsel %vm314_vm2, %v218_v54, %v351_v6  ;;  %v73_v14 = vrot.slane %v72_v7, 4  ;;  %v87_v15 = vrot.slane %v86_v8, 4  ;;  %p704_p13 = scmp.ne.s32.totalorder %s616_s21, %s703_s1  ;;  %p709_p1 = scmp.lt.s32.totalorder %s703_s1, %s703_s1 }
  0x34   :  { %v353_v16 = vsel %vm316_vm3, %v232_v56, %v352_v13  ;;  %v100_v17 = vsel %vm71_vm0, %v774_v2, 0.0  ;;  %v114_v18 = vsel %vm71_vm0, %v776_v3, 0.0  ;;  %v128_v19 = vsel %vm71_vm0, %v778_v4, 0.0 }
  0x35   :  { %v354_v0 = vsel %vm318_vm4, %v246_v60, %v353_v16  ;;  %v74_v20 = vadd.f32 %v73_v14, %v72_v7  ;;  %v88_v21 = vadd.f32 %v87_v15, %v86_v8  ;;  %v101_v22 = vrot.slane %v100_v17, 4  ;;  %p710_p2 = por %p709_p1, %p708_p0 }
  0x36   :  { %v355_v23 = vsel %vm320_vm5, %v260_v61, %v354_v0  ;;  %v115_v24 = vrot.slane %v114_v18, 4  ;;  %v129_v25 = vrot.slane %v128_v19, 4  ;;  %v142_v26 = vsel %vm71_vm0, %v780_v5, 0.0 }
  0x37   :  { %v356_v27 = vsel %vm322_vm6, %v274_v62, %v355_v23  ;;  %v75_v28 = vrot.slane %v74_v20, 2  ;;  %v89_v29 = vrot.slane %v88_v21, 2  ;;  %v102_v30 = vadd.f32 %v101_v22, %v100_v17  ;;  %p711_p3 = pnand %p710_p2, %p704_p13 }
  0x38   :  { %v825_v31 = vsel %vm324_vm7, %v288_v12, %v356_v27  ;;  %v116_v32 = vadd.f32 %v115_v24, %v114_v18  ;;  %v130_v33 = vadd.f32 %v129_v25, %v128_v19  ;;  %v143_v34 = vrot.slane %v142_v26, 4 }
  0x39   :  { %401 = vrot.lane.b32.xlu1 %v825_v31, %s735_s0  ;;  %v76_v35 = vadd.f32 %v75_v28, %v74_v20  ;;  %v90_v36 = vadd.f32 %v89_v29, %v88_v21  ;;  %v103_v37 = vrot.slane %v102_v30, 2  ;;  %v156_v38 = vsel %vm71_vm0, %v792_v10, 0.0 }
  0x3a   :  { %v117_v39 = vrot.slane %v116_v32, 2  ;;  %v131_v40 = vrot.slane %v130_v33, 2  ;;  %v144_v41 = vadd.f32 %v143_v34, %v142_v26  ;;  %v157_v42 = vrot.slane %v156_v38, 4 }
  0x3b   :  { %v77_v43 = vrot.slane %v76_v35, 1  ;;  %v91_v44 = vrot.slane %v90_v36, 1  ;;  %v104_v45 = vadd.f32 %v103_v37, %v102_v30  ;;  %v170_v46 = vsel %vm71_vm0, %v794_v11, 0.0 }
  0x3c   :  { %v118_v47 = vadd.f32 %v117_v39, %v116_v32  ;;  %v132_v48 = vadd.f32 %v131_v40, %v130_v33  ;;  %v145_v49 = vrot.slane %v144_v41, 2  ;;  %v158_v50 = vadd.f32 %v157_v42, %v156_v38 }
  0x3d   :  { %v78_v51 = vadd.f32 %v77_v43, %v76_v35  ;;  %v92_v52 = vadd.f32 %v91_v44, %v90_v36  ;;  %v105_v53 = vrot.slane %v104_v45, 1  ;;  %v171_v54 = vrot.slane %v170_v46, 4 }
  0x3e   :  { %v119_v55 = vrot.slane %v118_v47, 1  ;;  %v133_v56 = vrot.slane %v132_v48, 1  ;;  %v146_v57 = vadd.f32 %v145_v49, %v144_v41  ;;  %v159_v58 = vrot.slane %v158_v50, 2 }
  0x3f   :  { %v106_v59 = vadd.f32 %v105_v53, %v104_v45  ;;  %v172_v60 = vadd.f32 %v171_v54, %v170_v46  ;;  %v313_v61 = vsel %vm312_vm1, %v92_v52, %v78_v51  ;;  %v836_v62 = vcombine.high %v772_v1, %v772_v1 }
  0x40   :  { %v120_v63 = vadd.f32 %v119_v55, %v118_v47  ;;  %v134_v6 = vadd.f32 %v133_v56, %v132_v48  ;;  %v147_v7 = vrot.slane %v146_v57, 1  ;;  %v160_v8 = vadd.f32 %v159_v58, %v158_v50 }
  0x41   :  { %v173_v12 = vrot.slane %v172_v60, 2  ;;  %v315_v13 = vsel %vm314_vm2, %v106_v59, %v313_v61  ;;  %v841_v14 = vcombine.high %v774_v2, %v774_v2  ;;  %v845_v15 = vcombine.high %v776_v3, %v776_v3 }
  0x42   :  { %v148_v16 = vadd.f32 %v147_v7, %v146_v57  ;;  %v161_v17 = vrot.slane %v160_v8, 1  ;;  %v317_v1 = vsel %vm316_vm3, %v120_v63, %v315_v13  ;;  %v850_v18 = vcombine.high %v778_v4, %v778_v4 }
  0x43   :  { %v174_v19 = vadd.f32 %v173_v12, %v172_v60  ;;  %v319_v0 = vsel %vm318_vm4, %v134_v6, %v317_v1  ;;  %v855_v20 = vcombine.high %v780_v5, %v780_v5  ;;  %v859_v2 = vcombine.high %v792_v10, %v792_v10 }
  0x44   :  { %v162_v3 = vadd.f32 %v161_v17, %v160_v8  ;;  %v321_v21 = vsel %vm320_vm5, %v148_v16, %v319_v0  ;;  %v864_v22 = vcombine.high %v794_v11, %v794_v11  ;;  %v79_v4 = vsel %vm71_vm0, %v790_v9, 0.0 }
  0x45   :  { %v175_v23 = vrot.slane %v174_v19, 1  ;;  %v80_v24 = vrot.slane %v79_v4, 4  ;;  %v93_v5 = vsel %vm71_vm0, %v836_v62, 0.0  ;;  %v107_v25 = vsel %vm71_vm0, %v841_v14, 0.0 }
  0x46   :  { %v323_v10 = vsel %vm322_vm6, %v162_v3, %v321_v21  ;;  %v94_v26 = vrot.slane %v93_v5, 4  ;;  %v108_v27 = vrot.slane %v107_v25, 4  ;;  %v121_v28 = vsel %vm71_vm0, %v845_v15, 0.0 }
  0x47   :  { %v176_v11 = vadd.f32 %v175_v23, %v174_v19  ;;  %v81_v29 = vadd.f32 %v80_v24, %v79_v4  ;;  %v122_v30 = vrot.slane %v121_v28, 4  ;;  %v135_v32 = vsel %vm71_vm0, %v850_v18, 0.0 }
  0x48   :  { %v95_v33 = vadd.f32 %v94_v26, %v93_v5  ;;  %v109_v34 = vadd.f32 %v108_v27, %v107_v25  ;;  %v136_v35 = vrot.slane %v135_v32, 4  ;;  %v149_v36 = vsel %vm71_vm0, %v855_v20, 0.0 }
  0x49   :  { %v880_v37 = vsel %vm324_vm7, %v176_v11, %v323_v10  ;;  %v82_v38 = vrot.slane %v81_v29, 2  ;;  %v123_v39 = vadd.f32 %v122_v30, %v121_v28  ;;  %v150_v40 = vrot.slane %v149_v36, 4 }
  0x4a   :  { %376 = vrot.lane.b32.xlu0 %v880_v37, %s736_s27  ;;  %v96_v41 = vrot.slane %v95_v33, 2  ;;  %v110_v42 = vrot.slane %v109_v34, 2  ;;  %v137_v43 = vadd.f32 %v136_v35, %v135_v32  ;;  %v163_v44 = vsel %vm71_vm0, %v859_v2, 0.0 }
  0x4b   :  { %v83_v45 = vadd.f32 %v82_v38, %v81_v29  ;;  %v124_v46 = vrot.slane %v123_v39, 2  ;;  %v151_v47 = vadd.f32 %v150_v40, %v149_v36  ;;  %v164_v48 = vrot.slane %v163_v44, 4 }
  0x4c   :  { %v97_v49 = vadd.f32 %v96_v41, %v95_v33  ;;  %v111_v50 = vadd.f32 %v110_v42, %v109_v34  ;;  %v138_v51 = vrot.slane %v137_v43, 2  ;;  %v177_v52 = vsel %vm71_vm0, %v864_v22, 0.0 }
  0x4d   :  { %v84_v53 = vrot.slane %v83_v45, 1  ;;  %v125_v54 = vadd.f32 %v124_v46, %v123_v39  ;;  %v152_v55 = vrot.slane %v151_v47, 2  ;;  %v165_v56 = vadd.f32 %v164_v48, %v163_v44 }
  0x4e   :  { %378 = vrot.lane.b32.xlu0 %v825_v31, %s736_s27  ;;  %v98_v57 = vrot.slane %v97_v49, 1  ;;  %v112_v58 = vrot.slane %v111_v50, 1  ;;  %v139_v59 = vadd.f32 %v138_v51, %v137_v43  ;;  %v178_v60 = vrot.slane %v177_v52, 4 }
  0x4f   :  { %v85_v61 = vadd.f32 %v84_v53, %v83_v45  ;;  %v126_v63 = vrot.slane %v125_v54, 1  ;;  %v153_v6 = vadd.f32 %v152_v55, %v151_v47  ;;  %v166_v7 = vrot.slane %v165_v56, 2 }
  0x50   :  { %v99_v8 = vadd.f32 %v98_v57, %v97_v49  ;;  %v113_v12 = vadd.f32 %v112_v58, %v111_v50  ;;  %v140_v13 = vrot.slane %v139_v59, 1  ;;  %v179_v16 = vadd.f32 %v178_v60, %v177_v52 }
  0x51   :  { %v127_v17 = vadd.f32 %v126_v63, %v125_v54  ;;  %v154_v1 = vrot.slane %v153_v6, 1  ;;  %v167_v19 = vadd.f32 %v166_v7, %v165_v56  ;;  %v191_v0 = vsel %vm71_vm0, %v790_v9, -inf }
  0x52   :  { %v141_v3 = vadd.f32 %v140_v13, %v139_v59  ;;  %v180_v21 = vrot.slane %v179_v16, 2  ;;  %v326_v4 = vsel %vm312_vm1, %v99_v8, %v85_v61  ;;  %399 = vrot.lane.b32.xlu0 %v880_v37, %s735_s0  ;;  %v192_v23 = vrot.slane %v191_v0, 4 }
  0x53   :  { %v155_v24 = vadd.f32 %v154_v1, %v153_v6  ;;  %v168_v5 = vrot.slane %v167_v19, 1  ;;  %v327_v25 = vsel %vm314_vm2, %v113_v12, %v326_v4  ;;  %v205_v10 = vsel %vm71_vm0, %v836_v62, -inf }
  0x54   :  { %v181_v26 = vadd.f32 %v180_v21, %v179_v16  ;;  %v328_v27 = vsel %vm316_vm3, %v127_v17, %v327_v25  ;;  %v193_v28 = vmax.f32 %v191_v0, %v192_v23  ;;  %v206_v9 = vrot.slane %v205_v10, 4 }
  0x55   :  { %v169_v11 = vadd.f32 %v168_v5, %v167_v19  ;;  %v329_v29 = vsel %vm318_vm4, %v141_v3, %v328_v27  ;;  %v219_v30 = vsel %vm71_vm0, %v841_v14, -inf  ;;  %v233_v32 = vsel %vm71_vm0, %v845_v15, -inf }
  0x56   :  { %v182_v33 = vrot.slane %v181_v26, 1  ;;  %v330_v34 = vsel %vm320_vm5, %v155_v24, %v329_v29  ;;  %v194_v35 = vrot.slane %v193_v28, 2  ;;  %v207_v36 = vmax.f32 %v205_v10, %v206_v9 }
  0x57   :  { %v331_v62 = vsel %vm322_vm6, %v169_v11, %v330_v34  ;;  %v220_v38 = vrot.slane %v219_v30, 4  ;;  %v234_v39 = vrot.slane %v233_v32, 4  ;;  %v247_v40 = vsel %vm71_vm0, %v850_v18, -inf }
  0x58   :  { %v183_v41 = vadd.f32 %v182_v33, %v181_v26  ;;  %v195_v42 = vmax.f32 %v193_v28, %v194_v35  ;;  %v208_v43 = vrot.slane %v207_v36, 2  ;;  %v248_v44 = vrot.slane %v247_v40, 4 }
  0x59   :  { %v221_v14 = vmax.f32 %v219_v30, %v220_v38  ;;  %v235_v45 = vmax.f32 %v233_v32, %v234_v39  ;;  %v261_v15 = vsel %vm71_vm0, %v855_v20, -inf  ;;  %v275_v46 = vsel %vm71_vm0, %v859_v2, -inf }
  0x5a   :  { %v913_v47 = vsel %vm324_vm7, %v183_v41, %v331_v62  ;;  %v196_v48 = vrot.slane %v195_v42, 1  ;;  %v209_v49 = vmax.f32 %v207_v36, %v208_v43  ;;  %v249_v50 = vmax.f32 %v247_v40, %v248_v44 }
  0x5b   :  { %380 = vrot.lane.b32.xlu1 %v913_v47, %s736_s27  ;;  %v222_v18 = vrot.slane %v221_v14, 2  ;;  %v236_v51 = vrot.slane %v235_v45, 2  ;;  %v262_v52 = vrot.slane %v261_v15, 4  ;;  %v276_v53 = vrot.slane %v275_v46, 4  ;;  %403 = vrot.lane.b32.xlu0 %v913_v47, %s735_s0 }
  0x5c   :  { %v197_v20 = vmax.f32 %v195_v42, %v196_v48  ;;  %v210_v54 = vrot.slane %v209_v49, 1  ;;  %v250_v55 = vrot.slane %v249_v50, 2  ;;  %v289_v2 = vsel %vm71_vm0, %v864_v22, -inf }
  0x5d   :  { %v223_v56 = vmax.f32 %v221_v14, %v222_v18  ;;  %v237_v57 = vmax.f32 %v235_v45, %v236_v51  ;;  %v263_v58 = vmax.f32 %v261_v15, %v262_v52  ;;  %v277_v59 = vmax.f32 %v275_v46, %v276_v53 }
  0x5e   :  { %v211_v60 = vmax.f32 %v209_v49, %v210_v54  ;;  %v251_v61 = vmax.f32 %v249_v50, %v250_v55  ;;  %v290_v63 = vrot.slane %v289_v2, 4  ;;  %v367_v32 = vlaneseq }
  0x5f   :  { %v224_v6 = vrot.slane %v223_v56, 1  ;;  %v238_v7 = vrot.slane %v237_v57, 1  ;;  %v264_v8 = vrot.slane %v263_v58, 2  ;;  %v278_v12 = vrot.slane %v277_v59, 2 }
  0x60   :  { %v252_v13 = vrot.slane %v251_v61, 1  ;;  %v291_v16 = vmax.f32 %v289_v2, %v290_v63  ;;  %v358_v17 = vsel %vm312_vm1, %v211_v60, %v197_v20  ;;  %v934_v34 = vand.u32 127, %v367_v32 }
  0x61   :  { %v225_v1 = vmax.f32 %v223_v56, %v224_v6  ;;  %v239_v19 = vmax.f32 %v237_v57, %v238_v7  ;;  %v265_v0 = vmax.f32 %v263_v58, %v264_v8  ;;  %v279_v3 = vmax.f32 %v277_v59, %v278_v12 }
  0x62   :  { %v253_v22 = vmax.f32 %v251_v61, %v252_v13  ;;  %v292_v21 = vrot.slane %v291_v16, 2  ;;  %v941_v36 = vadd.s32 128, %v934_v34  ;;  %v370_v38 = vand.u32 15, %v934_v34 }
  0x63   :  { %v266_v4 = vrot.slane %v265_v0, 1  ;;  %v280_v23 = vrot.slane %v279_v3, 1  ;;  %v359_v24 = vsel %vm314_vm2, %v225_v1, %v358_v17  ;;  %v437_v41 = vstv %s627_s28 }
  0x64   :  { %v293_v5 = vmax.f32 %v291_v16, %v292_v21  ;;  %v360_v25 = vsel %vm316_vm3, %v239_v19, %v359_v24  ;;  %v371_v39 = vand.u32 15, %v941_v36  ;;  %vm384_vm8 = vcmp.lt.s32.totalorder %v934_v34, 1 }
  0x65   :  { %v267_v10 = vmax.f32 %v265_v0, %v266_v4  ;;  %v281_v26 = vmax.f32 %v279_v3, %v280_v23  ;;  %v361_v27 = vsel %vm318_vm4, %v253_v22, %v360_v25  ;;  %v477_v42 = vstv %s938_s29 }
  0x66   :  { %v294_v28 = vrot.slane %v293_v5, 1  ;;  %vm957_vm9 = vcmp.ge.s32.totalorder %v370_v38, 1  ;;  %vm961_vm10 = vcmp.ge.s32.totalorder %v371_v39, 1  ;;  %v427_v14 = vstv %s943_s30 }
  0x67   :  { %v362_v9 = vsel %vm320_vm5, %v267_v10, %v361_v27  ;;  %vm407_vm11 = vcmp.lt.s32.totalorder %v934_v34, 127  ;;  %v441_v45 = vmul.f32 %v437_v41, %v880_v37  ;;  %v467_v15 = vstv %s945_s3 }
  0x68   :  { %v295_v11 = vmax.f32 %v293_v5, %v294_v28  ;;  %v363_v29 = vsel %vm322_vm6, %v281_v26, %v362_v9  ;;  %vm971_vm12 = vcmp.le.s32.totalorder %v370_v38, 14  ;;  %vm975_vm13 = vcmp.le.s32.totalorder %v371_v39, 14 }
  0x69   :  { %v442_v50 = vmul.f32 %v437_v41, %v913_v47  ;;  %v451_v18 = vstv %s947_s4  ;;  %v491_v51 = vstv %s949_s5  ;;  %v481_v53 = vmul.f32 %v477_v42, %v880_v37 }
  0x6a   :  { %v928_v30 = vsel %vm324_vm7, %v295_v11, %v363_v29  ;;  %v482_v1 = vmul.f32 %v477_v42, %v913_v47  ;;  %v532_v19 = vstv %s969_s6  ;;  %v542_v0 = vstv %s979_s7 }
  0x6b   :  { %382 = vrot.lane.b32.xlu1 %v928_v30, %s736_s27  ;;  %v556_v23 = vstv %s989_s8  ;;  %v546_v25 = vmul.f32 %v542_v0, %v880_v37  ;;  %v438_v28 = vstv %s1003_s9  ;;  %v547_v11 = vmul.f32 %v542_v0, %v913_v47 }
  0x6c   :  { %v428_v29 = vstv %s1007_s10  ;;  %v468_v32 = vstv %s1014_s11  ;;  %v478_v37 = vstv %s1016_s12  ;;  %v444_v41 = vmul.f32 %v438_v28, %v928_v30 }
  0x6d   :  { %vm511_vm14 = vcmp.lt.s32.totalorder %v934_v34, 16  ;;  %vm576_vm15 = vcmp.lt.s32.totalorder %v934_v34, 112 }
  0x6f   :  { %405 = vrot.lane.b32.xlu1 %v928_v30, %s735_s0 }
  0xab   :  { %v951_v62 = vpop.permute.xlu1 %401 }
  0xbc   :  { %v377_v33 = vpop.permute.xlu0 %376 }
  0xc0   :  { %v936_v35 = vpop.permute.xlu0 %378 }
  0xc4   :  { %v400_v40 = vpop.permute.xlu0 %399 }
  0xcd   :  { %v381_v49 = vpop.permute.xlu1 %380  ;;  %v404_v52 = vpop.permute.xlu0 %403 }
  0xce   :  { %v385_v20 = vsel %vm384_vm8, %v377_v33, %v381_v49  ;;  %v387_v54 = vsel %vm384_vm8, %v381_v49, %v377_v33  ;;  %v408_v55 = vsel %vm407_vm11, %v400_v40, %v404_v52  ;;  %v410_v2 = vsel %vm407_vm11, %v404_v52, %v400_v40 }
  0xcf   :  { %v393_v56 = vsel %vm957_vm9, %v387_v54, 0.0  ;;  %v394_v57 = vsel %vm961_vm10, %v385_v20, 0.0  ;;  %v416_v58 = vsel %vm971_vm12, %v408_v55, 0.0  ;;  %v417_v59 = vsel %vm975_vm13, %v410_v2, 0.0 }
  0xd0   :  { %v431_v60 = vmul.f32 %v427_v14, %v393_v56  ;;  %v432_v61 = vmul.f32 %v427_v14, %v394_v57  ;;  %v471_v63 = vmul.f32 %v467_v15, %v393_v56  ;;  %v455_v6 = vmul.f32 %v451_v18, %v416_v58 }
  0xd1   :  { %v456_v7 = vmul.f32 %v451_v18, %v417_v59  ;;  %v495_v13 = vmul.f32 %v491_v51, %v416_v58  ;;  %v472_v16 = vmul.f32 %v467_v15, %v394_v57  ;;  %v496_v21 = vmul.f32 %v491_v51, %v417_v59 }
  0xd2   :  { %v445_v8 = vadd.f32 %v441_v45, %v431_v60  ;;  %v446_v12 = vadd.f32 %v442_v50, %v432_v61  ;;  %v485_v17 = vadd.f32 %v481_v53, %v471_v63  ;;  %v536_v24 = vmul.f32 %v532_v19, %v393_v56 }
  0xd3   :  { %v486_v5 = vadd.f32 %v482_v1, %v472_v16  ;;  %v560_v10 = vmul.f32 %v556_v23, %v416_v58  ;;  %v537_v27 = vmul.f32 %v532_v19, %v394_v57  ;;  %v561_v38 = vmul.f32 %v556_v23, %v417_v59 }
  0xd4   :  { %v1010_v3 = vadd.f32 %v455_v6, %v445_v8  ;;  %v1012_v22 = vadd.f32 %v456_v7, %v446_v12  ;;  %v499_v4 = vadd.f32 %v495_v13, %v485_v17  ;;  %v550_v9 = vadd.f32 %v546_v25, %v536_v24 }
  0xd5   :  { %v500_v26 = vadd.f32 %v496_v21, %v486_v5  ;;  %v443_v40 = vmul.f32 %v438_v28, %v825_v31  ;;  %v551_v15 = vadd.f32 %v547_v11, %v537_v27  ;;  %v483_v51 = vmul.f32 %v478_v37, %v825_v31 }
  0xd6   :  { %503 = vrot.lane.b32.xlu0 %v499_v4, %s737_s13  ;;  %v564_v39 = vadd.f32 %v560_v10, %v550_v9  ;;  %v452_v52 = vstv %s1021_s14  ;;  %v492_v53 = vstv %s1023_s15  ;;  %v484_v58 = vmul.f32 %v478_v37, %v928_v30 }
  0xd7   :  { %v565_v43 = vadd.f32 %v561_v38, %v551_v15  ;;  %v533_v6 = vstv %s1030_s16  ;;  %v543_v7 = vstv %s1033_s17  ;;  %v557_v16 = vstv %s1047_s18 }
  0xd8   :  { %v548_v17 = vmul.f32 %v543_v7, %v825_v31  ;;  %v549_v4 = vmul.f32 %v543_v7, %v928_v30  ;;  %v372_v28 = vshra.s32 %v934_v34, 4  ;;  %v373_v9 = vshra.s32 %v941_v36, 4 }
  0xda   :  { %507 = vrot.lane.b32.xlu0 %v500_v26, %s737_s13  ;;  %vm1078_vm0 = vcmp.ge.s32.totalorder %v372_v28, 1  ;;  %vm1082_vm1 = vcmp.ge.s32.totalorder %v373_v9, 1  ;;  %vm1086_vm2 = vcmp.le.s32.totalorder %v372_v28, 14  ;;  %vm1090_vm3 = vcmp.le.s32.totalorder %v373_v9, 14 }
  0xdd   :  { %v383_v33 = vpop.permute.xlu1 %382 }
  0xde   :  { %v386_v47 = vsel %vm384_vm8, %v936_v35, %v383_v33  ;;  %v388_v42 = vsel %vm384_vm8, %v383_v33, %v936_v35  ;;  %568 = vrot.lane.b32.xlu0 %v564_v39, %s738_s19 }
  0xdf   :  { %v395_v14 = vsel %vm957_vm9, %v388_v42, 0.0  ;;  %v396_v45 = vsel %vm961_vm10, %v386_v47, 0.0 }
  0xe0   :  { %v433_v49 = vmul.f32 %v428_v29, %v395_v14  ;;  %v434_v50 = vmul.f32 %v428_v29, %v396_v45  ;;  %v473_v18 = vmul.f32 %v468_v32, %v395_v14  ;;  %v474_v2 = vmul.f32 %v468_v32, %v396_v45 }
  0xe1   :  { %v406_v35 = vpop.permute.xlu1 %405  ;;  %v538_v46 = vmul.f32 %v533_v6, %v395_v14  ;;  %v539_v0 = vmul.f32 %v533_v6, %v396_v45 }
  0xe2   :  { %v447_v20 = vadd.f32 %v443_v40, %v433_v49  ;;  %v448_v44 = vadd.f32 %v444_v41, %v434_v50  ;;  %v409_v54 = vsel %vm407_vm11, %v951_v62, %v406_v35  ;;  %v411_v55 = vsel %vm407_vm11, %v406_v35, %v951_v62  ;;  %572 = vrot.lane.b32.xlu0 %v565_v43, %s738_s19 }
  0xe3   :  { %v418_v56 = vsel %vm971_vm12, %v409_v54, 0.0  ;;  %v419_v57 = vsel %vm975_vm13, %v411_v55, 0.0  ;;  %v487_v63 = vadd.f32 %v483_v51, %v473_v18  ;;  %v488_v48 = vadd.f32 %v484_v58, %v474_v2 }
  0xe4   :  { %v457_v59 = vmul.f32 %v452_v52, %v418_v56  ;;  %v458_v60 = vmul.f32 %v452_v52, %v419_v57  ;;  %v497_v61 = vmul.f32 %v492_v53, %v418_v56  ;;  %v498_v8 = vmul.f32 %v492_v53, %v419_v57 }
  0xe5   :  { %v562_v1 = vmul.f32 %v557_v16, %v418_v56  ;;  %v552_v21 = vadd.f32 %v548_v17, %v538_v46  ;;  %v563_v23 = vmul.f32 %v557_v16, %v419_v57  ;;  %v553_v5 = vadd.f32 %v549_v4, %v539_v0 }
  0xe6   :  { %v501_v62 = vadd.f32 %v497_v61, %v487_v63  ;;  %v462_v12 = vadd.f32 %v458_v60, %v448_v44  ;;  %v461_v13 = vadd.f32 %v457_v59, %v447_v20  ;;  %v502_v19 = vadd.f32 %v498_v8, %v488_v48 }
  0xe7   :  { %v566_v24 = vadd.f32 %v562_v1, %v552_v21  ;;  %v567_v25 = vadd.f32 %v563_v23, %v553_v5 }
  0xe8   :  { %505 = vrot.lane.b32.xlu1 %v501_v62, %s737_s13 }
  0xec   :  { %509 = vrot.lane.b32.xlu1 %v502_v19, %s737_s13 }
  0xf0   :  { %570 = vrot.lane.b32.xlu1 %v566_v24, %s738_s19 }
  0xf4   :  { %574 = vrot.lane.b32.xlu1 %v567_v25, %s738_s19 }
 0x148   :  { %v504_v10 = vpop.permute.xlu0 %503 }
 0x14c   :  { %v508_v26 = vpop.permute.xlu0 %507 }
 0x14d   :  { %v512_v33 = vsel %vm511_vm14, %v504_v10, %v508_v26  ;;  %v514_v38 = vsel %vm511_vm14, %v508_v26, %v504_v10 }
 0x14e   :  { %v520_v42 = vsel %vm1078_vm0, %v514_v38, 0.0  ;;  %v521_v14 = vsel %vm1082_vm1, %v512_v33, 0.0 }
 0x14f   :  { %v524_v51 = vadd.f32 %v520_v42, %v1010_v3  ;;  %v525_v52 = vadd.f32 %v521_v14, %v1012_v22 }
 0x150   :  { %v569_v27 = vpop.permute.xlu0 %568 }
 0x154   :  { %v573_v30 = vpop.permute.xlu0 %572 }
 0x155   :  { %v577_v39 = vsel %vm576_vm15, %v569_v27, %v573_v30  ;;  %v579_v40 = vsel %vm576_vm15, %v573_v30, %v569_v27 }
 0x156   :  { %v585_v15 = vsel %vm1086_vm2, %v577_v39, 0.0  ;;  %v586_v49 = vsel %vm1090_vm3, %v579_v40, 0.0 }
 0x157   :  { %v589_v35 = vadd.f32 %v585_v15, %v524_v51  ;;  %v590_v43 = vadd.f32 %v586_v49, %v525_v52 }
 0x15a   :  { %v506_v31 = vpop.permute.xlu1 %505 }
 0x15e   :  { %v510_v32 = vpop.permute.xlu1 %509 }
 0x15f   :  { %v513_v41 = vsel %vm511_vm14, %v506_v31, %v510_v32  ;;  %v515_v47 = vsel %vm511_vm14, %v510_v32, %v506_v31 }
 0x160   :  { %v522_v50 = vsel %vm1078_vm0, %v515_v47, 0.0  ;;  %v523_v18 = vsel %vm1082_vm1, %v513_v41, 0.0 }
 0x161   :  { %v526_v20 = vadd.f32 %v522_v50, %v461_v13  ;;  %v527_v44 = vadd.f32 %v523_v18, %v462_v12 }
 0x162   :  { %v571_v45 = vpop.permute.xlu1 %570 }
 0x166   :  { %v575_v53 = vpop.permute.xlu1 %574 }
 0x167   :  { %v578_v54 = vsel %vm576_vm15, %v571_v45, %v575_v53  ;;  %v580_v55 = vsel %vm576_vm15, %v575_v53, %v571_v45 }
 0x168   :  { %v587_v2 = vsel %vm1086_vm2, %v578_v54, 0.0  ;;  %v588_v56 = vsel %vm1090_vm3, %v580_v55, 0.0 }
 0x169   :  { %v591_v3 = vadd.f32 %v587_v2, %v526_v20  ;;  %v592_v57 = vadd.f32 %v588_v56, %v527_v44 }
 0x16b   :  { %v593_v22 = vadd.f32 %v591_v3, %v589_v35  ;;  %v594_v58 = vadd.f32 %v592_v57, %v590_v43 }
 0x16d   :  { %v642_v59 = vmul.f32 -1.442695, %v593_v22  ;;  %v643_v60 = vmul.f32 -1.442695, %v594_v58 }
 0x16f   :  { %661 = vpow2.f32 %v642_v59 }
 0x170   :  { %663 = vpow2.f32 %v643_v60 }
 0x179   :  { %v662_v61 = vpop.eup %661 }
 0x17a   :  { %v664_v63 = vpop.eup %663  ;;  %v601_v6 = vadd.f32 1.0, %v662_v61 }
 0x17b   :  { %v602_v7 = vadd.f32 1.0, %v664_v63 }
 0x17c   :  { %665 = vrcp.f32 %v601_v6 }
 0x17d   :  { %667 = vrcp.f32 %v602_v7 }
 0x186   :  { %v666_v34 = vpop.eup %665 }
 0x187   :  { %v668_v8 = vpop.eup %667  ;;  %607 = vst [vmem:[#allocation7] sm:$0xff] %v666_v34 }
 0x188   :  { %608 = vst [vmem:[#allocation7 + $0x8] sm:$0xff] %v668_v8 }
 0x189   :  { %714 = shalt.err (!%p711_p3)
}
 0x18a   :  { %s715_s24 = scalar_lea.hbm %s1134_s2, 256 }
 0x18b   :  { %p716_p4 = scmp.ne.s32.totalorder %s1134_s2, %s715_s24  ;;  %p719_p5 = scmp.lt.u32.totalorder %s715_s24, %s1134_s2 }
 0x18d   :  { %p721_p6 = pnand %p719_p5, %p716_p4 }
 0x18f   :  { %724 = shalt.err (!%p721_p6)
}
 0x190   :  { %618 = dma.vmem_to_hbm [thread:$0]  %s616_s21, 256, %s1134_s2, [#allocation4]  }
 0x191   :  { %729 = dma.done.wait [#allocation4], 256  }
 0x192   :  { %730 = vsyncadd [#allocation4], 4294967040 }
 0x193   :  { %622 = vsyncpa [#allocation3], 1 }
 0x194   :  { %623 = vsyncpa [#allocation4], 1 }
 0x195   :  { %624 = vsyncpa [#allocation5], 1 }

</bundles_post_ra>
